<compile_context>
chip_gen: v7x
topology: tpu7x:2x2x1
jax: 0.10.0
libtpu: 0.0.40
codegen_flags: <defaults>
</compile_context>

<pallas_src>
import functools

import jax
import jax.numpy as jnp
from jax.experimental import pallas as pl
from jax.experimental.pallas import tpu as pltpu


def _mlp_kernel(x_ref, wh_ref, bh_ref, wf_ref, bf_ref, o_ref, *, depth):
    # x_ref : (tm, D)          f32 batch tile
    # wh_ref: (depth, D, D)    bf16 hidden-layer weights (resident across the grid)
    # bh_ref: (depth, D)       f32 hidden-layer biases
    # wf_ref: (D, n_out_p)     bf16 final-layer weight (lane-padded to 128)
    # bf_ref: (1, n_out_p)     f32 final-layer bias (lane-padded to 128)
    # o_ref : (tm, n_out_p)    f32 output tile (lane-dense)
    h = x_ref[...].astype(jnp.float32)
    # Static unroll: depth is small here.
    # TODO(synk): for depth >~ 8 switch to lax.fori_loop(..., unroll=True) to
    #             bound vreg live ranges.
    for i in range(depth):
        acc = jnp.dot(h.astype(jnp.bfloat16), wh_ref[i],
                      preferred_element_type=jnp.float32)
        b = bh_ref[pl.ds(i, 1), :]                     # (1, D), broadcasts over rows
        h = jnp.maximum(acc + b, 0.0)                  # bias-add + ReLU in f32 (VPU)
    out = jnp.dot(h.astype(jnp.bfloat16), wf_ref[...],
                  preferred_element_type=jnp.float32) + bf_ref[...]
    o_ref[...] = out.astype(o_ref.dtype)


def dnn_forward(x, wh, bh, wf, bf, *, tm=None):
    """Fused MLP forward as a single Pallas kernel, tiled over the batch."""
    B, D = x.shape
    depth = wh.shape[0]
    n_out = wf.shape[1]
    out_dtype = x.dtype

    LANE, SUB = 128, 8

    # --- lane-dense output: pad n_out up to a multiple of 128 ---------------
    n_out_p = ((n_out + LANE - 1) // LANE) * LANE
    if n_out_p != n_out:
        wf = jnp.pad(wf, ((0, 0), (0, n_out_p - n_out)))
        bf = jnp.pad(bf, ((0, 0), (0, n_out_p - n_out)))

    # --- parameter layout / dtype prep --------------------------------------
    bh2 = bh.reshape(depth, D).astype(jnp.float32)     # flattened biases
    wh_b = wh.astype(jnp.bfloat16)                     # bf16 MXU operands
    wf_b = wf.astype(jnp.bfloat16)

    # --- batch tile selection ------------------------------------------------
    b8 = ((B + SUB - 1) // SUB) * SUB
    if tm is None:
        tm = min(512, b8)
        # Keep >= 2 grid steps when the batch allows, so "parallel" semantics
        # can shard across the 2 TensorCores on v7x.
        while b8 // tm < 2 and tm > SUB and (tm // 2) % SUB == 0:
            tm //= 2
    B_pad = ((B + tm - 1) // tm) * tm
    if B_pad != B:
        x = jnp.pad(x, ((0, B_pad - B), (0, 0)))
    grid = (B_pad // tm,)

    # --- VMEM budget (double-buffered pipeline blocks + kernel temporaries) --
    per_buf = (tm * D * 4                      # x tile (f32)
               + tm * n_out_p * 4              # out tile (f32)
               + depth * D * D * 2             # hidden weights (bf16)
               + depth * max(D, LANE) * 4      # hidden biases (lane-padded)
               + D * n_out_p * 2               # final weight (bf16)
               + SUB * n_out_p * 4)            # final bias (sublane-padded)
    est = 2 * per_buf + 6 * tm * max(D, n_out_p) * 4
    vmem_limit = int(min(64 * 2**20, max(32 * 2**20, 2 * est)))

    kernel = functools.partial(_mlp_kernel, depth=depth)

    # NOTE: the weight/bias index_maps are constant, so the blocks stay resident.
    # For production-size weights on v7x (64 MiB VMEM) one would additionally
    # trim their double-buffering (pipeline_mode) or stream layers over an
    # extra "arbitrary" grid axis; unnecessary at these sizes.
    out_p = pl.pallas_call(
        kernel,
        out_shape=jax.ShapeDtypeStruct((B_pad, n_out_p), jnp.float32),
        grid_spec=pltpu.PrefetchScalarGridSpec(
            num_scalar_prefetch=0,
            grid=grid,
            in_specs=[
                pl.BlockSpec((tm, D), lambda i: (i, 0)),            # x: tile over batch
                pl.BlockSpec((depth, D, D), lambda i: (0, 0, 0)),   # hidden weights
                pl.BlockSpec((depth, D), lambda i: (0, 0)),         # hidden biases
                pl.BlockSpec((D, n_out_p), lambda i: (0, 0)),       # final weight
                pl.BlockSpec((1, n_out_p), lambda i: (0, 0)),       # final bias
            ],
            out_specs=pl.BlockSpec((tm, n_out_p), lambda i: (i, 0)),
        ),
        compiler_params=pltpu.CompilerParams(
            dimension_semantics=("parallel",),
            vmem_limit_bytes=vmem_limit,
        ),
    )(x, wh_b, bh2, wf_b, bf)

    return out_p[:B, :n_out].astype(out_dtype)


def dnn_reference_f32(x, wh, bh, wf, bf):
    h = x.astype(jnp.float32)
    for i in range(wh.shape[0]):
        h = jnp.maximum(h @ wh[i] + bh[i], 0.0)
    return (h @ wf + bf).astype(x.dtype)


def dnn_reference_bf16(x, wh, bh, wf, bf):
    # Mirrors the kernel numerics: bf16 MXU operands, f32 accumulation.
    h = x.astype(jnp.float32)
    for i in range(wh.shape[0]):
        acc = jnp.dot(h.astype(jnp.bfloat16), wh[i].astype(jnp.bfloat16),
                      preferred_element_type=jnp.float32)
        h = jnp.maximum(acc + bh[i], 0.0)
    out = jnp.dot(h.astype(jnp.bfloat16), wf.astype(jnp.bfloat16),
                  preferred_element_type=jnp.float32) + bf
    return out.astype(x.dtype)


if __name__ == "__main__":
    # Small, module-consistent shapes: input_dim = n_width = 32, depth = 2,
    # n_out = 4, batch = 8.
    B, D, n_out, depth = 8, 32, 4, 2

    key = jax.random.PRNGKey(0)
    kx, kwh, kbh, kwf, kbf = jax.random.split(key, 5)

    x = jax.random.normal(kx, (B, D), dtype=jnp.float32)

    # Deterministic parameter init (uniform, scaled like PyTorch's Linear default).
    bound = 1.0 / (D ** 0.5)
    wh = jax.random.uniform(kwh, (depth, D, D), jnp.float32, -bound, bound)
    bh = jax.random.uniform(kbh, (depth, D), jnp.float32, -bound, bound)
    wf = jax.random.uniform(kwf, (D, n_out), jnp.float32, -bound, bound)
    bf = jax.random.uniform(kbf, (1, n_out), jnp.float32, -bound, bound)

    out = dnn_forward(x, wh, bh, wf, bf)
    out = jax.block_until_ready(out)
    assert out.shape == (B, n_out)

    ref_bf16 = dnn_reference_bf16(x, wh, bh, wf, bf)
    ref_f32 = dnn_reference_f32(x, wh, bh, wf, bf)
    assert jnp.allclose(out, ref_bf16, atol=2e-3, rtol=2e-3), \
        "Pallas output mismatch vs bf16-operand reference"
    assert jnp.allclose(out, ref_f32, atol=5e-2, rtol=5e-2), \
        "Pallas output mismatch vs f32 reference"

    print("KERNEL_OK")
</pallas_src>

<mosaic_0001>
module attributes {stable_mosaic.version = 11 : i64} {
  func.func @_mlp_kernel(%arg0: i32, %arg1: memref<8x32xf32, #tpu.memory_space<vmem>>, %arg2: memref<2x32x32xbf16, #tpu.memory_space<vmem>>, %arg3: memref<2x32xf32, #tpu.memory_space<vmem>>, %arg4: memref<32x128xbf16, #tpu.memory_space<vmem>>, %arg5: memref<1x128xf32, #tpu.memory_space<vmem>>, %arg6: memref<8x128xf32, #tpu.memory_space<vmem>>) attributes {dimension_semantics = [#tpu.dimension_semantics<parallel>], iteration_bounds = array<i64: 1>, scalar_prefetch = 0 : i64, scratch_operands = 0 : i64, tpu.core_type = #tpu.core_type<tc>, window_params = [{transform_indices = @transform_0, window_bounds = array<i64: 8, 32>}, {pipeline_mode = #tpu.pipeline_mode<synchronous>, transform_indices = @transform_1, window_bounds = array<i64: 2, 32, 32>}, {pipeline_mode = #tpu.pipeline_mode<synchronous>, transform_indices = @transform_2, window_bounds = array<i64: 2, 32>}, {pipeline_mode = #tpu.pipeline_mode<synchronous>, transform_indices = @transform_3, window_bounds = array<i64: 32, 128>}, {pipeline_mode = #tpu.pipeline_mode<synchronous>, transform_indices = @transform_4, window_bounds = array<i64: 1, 128>}, {transform_indices = @transform_5, window_bounds = array<i64: 8, 128>}]} {
    %c0 = arith.constant 0 : index
    %c0_0 = arith.constant 0 : index
    %0 = vector.load %arg1[%c0, %c0_0] : memref<8x32xf32, #tpu.memory_space<vmem>>, vector<8x32xf32>
    %1 = arith.truncf %0 : vector<8x32xf32> to vector<8x32xbf16>
    %c0_1 = arith.constant 0 : index
    %c0_2 = arith.constant 0 : index
    %c0_3 = arith.constant 0 : index
    %2 = vector.load %arg2[%c0_1, %c0_2, %c0_3] : memref<2x32x32xbf16, #tpu.memory_space<vmem>>, vector<1x32x32xbf16>
    %3 = vector.shape_cast %2 : vector<1x32x32xbf16> to vector<32x32xbf16>
    %cst = arith.constant dense<0.000000e+00> : vector<8x32xf32>
    %4 = tpu.matmul %1, %3, %cst {dimension_numbers = #tpu.dot_dimension_numbers<[1], [0], [0], [1], [0, 0, 1, 1], [], []>} : vector<8x32xbf16>, vector<32x32xbf16>, vector<8x32xf32> -> vector<8x32xf32>
    %c0_4 = arith.constant 0 : index
    %c0_5 = arith.constant 0 : index
    %5 = vector.load %arg3[%c0_4, %c0_5] : memref<2x32xf32, #tpu.memory_space<vmem>>, vector<1x32xf32>
    %6 = vector.broadcast %5 : vector<1x32xf32> to vector<8x32xf32>
    %7 = arith.addf %4, %6 : vector<8x32xf32>
    %cst_6 = arith.constant 0.000000e+00 : f32
    %8 = vector.broadcast %cst_6 : f32 to vector<8x32xf32>
    %9 = arith.maximumf %7, %8 : vector<8x32xf32>
    %10 = arith.truncf %9 : vector<8x32xf32> to vector<8x32xbf16>
    %c1 = arith.constant 1 : index
    %c0_7 = arith.constant 0 : index
    %c0_8 = arith.constant 0 : index
    %11 = vector.load %arg2[%c1, %c0_7, %c0_8] : memref<2x32x32xbf16, #tpu.memory_space<vmem>>, vector<1x32x32xbf16>
    %12 = vector.shape_cast %11 : vector<1x32x32xbf16> to vector<32x32xbf16>
    %cst_9 = arith.constant dense<0.000000e+00> : vector<8x32xf32>
    %13 = tpu.matmul %10, %12, %cst_9 {dimension_numbers = #tpu.dot_dimension_numbers<[1], [0], [0], [1], [0, 0, 1, 1], [], []>} : vector<8x32xbf16>, vector<32x32xbf16>, vector<8x32xf32> -> vector<8x32xf32>
    %c1_10 = arith.constant 1 : index
    %c0_11 = arith.constant 0 : index
    %14 = vector.load %arg3[%c1_10, %c0_11] : memref<2x32xf32, #tpu.memory_space<vmem>>, vector<1x32xf32>
    %15 = vector.broadcast %14 : vector<1x32xf32> to vector<8x32xf32>
    %16 = arith.addf %13, %15 : vector<8x32xf32>
    %cst_12 = arith.constant 0.000000e+00 : f32
    %17 = vector.broadcast %cst_12 : f32 to vector<8x32xf32>
    %18 = arith.maximumf %16, %17 : vector<8x32xf32>
    %19 = arith.truncf %18 : vector<8x32xf32> to vector<8x32xbf16>
    %c0_13 = arith.constant 0 : index
    %c0_14 = arith.constant 0 : index
    %20 = vector.load %arg4[%c0_13, %c0_14] : memref<32x128xbf16, #tpu.memory_space<vmem>>, vector<32x128xbf16>
    %cst_15 = arith.constant dense<0.000000e+00> : vector<8x128xf32>
    %21 = tpu.matmul %19, %20, %cst_15 {dimension_numbers = #tpu.dot_dimension_numbers<[1], [0], [0], [1], [0, 0, 1, 1], [], []>} : vector<8x32xbf16>, vector<32x128xbf16>, vector<8x128xf32> -> vector<8x128xf32>
    %c0_16 = arith.constant 0 : index
    %c0_17 = arith.constant 0 : index
    %22 = vector.load %arg5[%c0_16, %c0_17] : memref<1x128xf32, #tpu.memory_space<vmem>>, vector<1x128xf32>
    %23 = vector.broadcast %22 : vector<1x128xf32> to vector<8x128xf32>
    %24 = arith.addf %21, %23 : vector<8x128xf32>
    %c0_18 = arith.constant 0 : index
    %c0_19 = arith.constant 0 : index
    %25 = vector.load %arg6[%c0_18, %c0_19] : memref<8x128xf32, #tpu.memory_space<vmem>>, vector<8x128xf32>
    tpu.vector_store %arg6[%c0_18, %c0_19], %24 {strides = array<i32>} : memref<8x128xf32, #tpu.memory_space<vmem>>, vector<8x128xf32>,
    return
  }
  func.func @transform_0(%arg0: i32) -> (i32, i32) {
    %c0_i32 = arith.constant 0 : i32
    %c0_i32_0 = arith.constant 0 : i32
    return %arg0, %c0_i32 : i32, i32
  }
  func.func @transform_1(%arg0: i32) -> (i32, i32, i32) {
    %c0_i32 = arith.constant 0 : i32
    %c0_i32_0 = arith.constant 0 : i32
    %c0_i32_1 = arith.constant 0 : i32
    %c0_i32_2 = arith.constant 0 : i32
    return %c0_i32, %c0_i32_0, %c0_i32_1 : i32, i32, i32
  }
  func.func @transform_2(%arg0: i32) -> (i32, i32) {
    %c0_i32 = arith.constant 0 : i32
    %c0_i32_0 = arith.constant 0 : i32
    %c0_i32_1 = arith.constant 0 : i32
    return %c0_i32, %c0_i32_0 : i32, i32
  }
  func.func @transform_3(%arg0: i32) -> (i32, i32) {
    %c0_i32 = arith.constant 0 : i32
    %c0_i32_0 = arith.constant 0 : i32
    %c0_i32_1 = arith.constant 0 : i32
    return %c0_i32, %c0_i32_0 : i32, i32
  }
  func.func @transform_4(%arg0: i32) -> (i32, i32) {
    %c0_i32 = arith.constant 0 : i32
    %c0_i32_0 = arith.constant 0 : i32
    %c0_i32_1 = arith.constant 0 : i32
    return %c0_i32, %c0_i32_0 : i32, i32
  }
  func.func @transform_5(%arg0: i32) -> (i32, i32) {
    %c0_i32 = arith.constant 0 : i32
    %c0_i32_0 = arith.constant 0 : i32
    return %arg0, %c0_i32 : i32, i32
  }
}

</mosaic_0001>

<bundles_post_ra>
// kernel: tpu_custom_call.1
= control target key start
LH: loop header
LB: loop body
LE: loop exit
PB: predicated region body
PF: predicated region fallthrough
CT: control target
= control target key end

     0   :  { %10 = vsyncpa [#allocation3], 0  ;;  %s537_s0 = inlined_call_operand.hbm [shape: f32[8,32], index: 0, kind: input, shape index: {}]   ;;  %s538_s1 = inlined_call_operand.hbm [shape: bf16[2,32,32], index: 1, kind: input, shape index: {}]   ;;  %s539_s2 = inlined_call_operand.vmem [shape: f32[2,32], index: 2, kind: input, shape index: {}]   ;;  %s540_s3 = inlined_call_operand.hbm [shape: bf16[32,128], index: 3, kind: input, shape index: {}]   ;;  %s541_s4 = inlined_call_operand.vmem [shape: f32[1,128], index: 4, kind: input, shape index: {}]   ;;  %s542_s5 = inlined_call_operand.hbm [shape: f32[8,128], index: 5, kind: output, shape index: {}]  }
   0x1   :  { %11 = vsyncpa [#allocation6], 0 }
   0x2   :  { %12 = vsyncpa [#allocation4], 0  ;;  %s433_s18 = smov [#allocation5]   ;;  %s339_s22 = scalar_lea.hbm %s538_s1, 512 }
   0x3   :  { %s28_s19 = sshll.u32 %s433_s18, 4  ;;  %p340_p0 = scmp.ne.s32.totalorder %s538_s1, %s339_s22  ;;  %s29_s19 = int_to_ptr.vmem [resolvable:$true] %s28_s19 }
   0x4   :  { %p343_p1 = scmp.lt.u32.totalorder %s339_s22, %s538_s1 }
   0x6   :  { %p345_p2 = pnand %p343_p1, %p340_p0 }
   0x8   :  { %348 = shalt.err (!%p345_p2)
}
   0x9   :  { %s349_s27 = scalar_lea.vmem %s29_s19, 512  ;;  %p354_p4 = scmp.lt.s32.totalorder %s29_s19, %s29_s19 }
   0xa   :  { %p350_p3 = scmp.ne.s32.totalorder %s29_s19, %s349_s27  ;;  %p355_p5 = scmp.lt.s32.totalorder %s349_s27, %s349_s27 }
   0xc   :  { %p356_p6 = por %p355_p5, %p354_p4 }
   0xe   :  { %p357_p7 = pnand %p356_p6, %p350_p3 }
  0x10   :  { %360 = shalt.err (!%p357_p7)
}
  0x11   :  { %s434_s28 = smov 64   ;;  %s435_s29 = smov 4  }
  0x12   :  { %34 = dma.hbm_to_vmem [thread:$0]  %s538_s1, 512, %s29_s19, [#allocation6], %s434_s28, %s434_s28, %s435_s29  }
  0x13   :  { %s436_s7 = smov [#allocation2]   ;;  %s437_s9 = smov [#allocation7]  }
  0x14   :  { %s19_s8 = sshll.u32 %s436_s7, 4  ;;  %s42_s10 = sshll.u32 %s437_s9, 4  ;;  %s20_s8 = int_to_ptr.vmem [resolvable:$true] %s19_s8  ;;  %s43_s10 = int_to_ptr.vmem [resolvable:$true] %s42_s10 }
  0x15   :  { %s361_s13 = scalar_lea.hbm %s537_s0, 128 }
  0x16   :  { %p362_p8 = scmp.ne.s32.totalorder %s537_s0, %s361_s13  ;;  %p365_p9 = scmp.lt.u32.totalorder %s361_s13, %s537_s0 }
  0x18   :  { %p367_p10 = pnand %p365_p9, %p362_p8 }
  0x1a   :  { %370 = shalt.err (!%p367_p10)
}
  0x1b   :  { %s371_s1 = scalar_lea.vmem %s20_s8, 128  ;;  %p376_p12 = scmp.lt.s32.totalorder %s20_s8, %s20_s8 }
  0x1c   :  { %p372_p11 = scmp.ne.s32.totalorder %s20_s8, %s371_s1  ;;  %p377_p13 = scmp.lt.s32.totalorder %s371_s1, %s371_s1 }
  0x1e   :  { %p378_p0 = por %p377_p13, %p376_p12 }
  0x20   :  { %p379_p1 = pnand %p378_p0, %p372_p11 }
  0x22   :  { %382 = shalt.err (!%p379_p1)
}
  0x23   :  { %22 = dma.hbm_to_vmem [thread:$0]  %s537_s0, 128, %s20_s8, [#allocation3]  }
  0x24   :  { %s383_s22 = scalar_lea.hbm %s540_s3, 256 }
  0x25   :  { %p384_p2 = scmp.ne.s32.totalorder %s540_s3, %s383_s22  ;;  %p387_p3 = scmp.lt.u32.totalorder %s383_s22, %s540_s3 }
  0x27   :  { %p389_p4 = pnand %p387_p3, %p384_p2 }
  0x29   :  { %392 = shalt.err (!%p389_p4)
}
  0x2a   :  { %s393_s27 = scalar_lea.vmem %s43_s10, 256  ;;  %p398_p6 = scmp.lt.s32.totalorder %s43_s10, %s43_s10 }
  0x2b   :  { %p394_p5 = scmp.ne.s32.totalorder %s43_s10, %s393_s27  ;;  %p399_p7 = scmp.lt.s32.totalorder %s393_s27, %s393_s27 }
  0x2d   :  { %p400_p8 = por %p399_p7, %p398_p6 }
  0x2f   :  { %p401_p9 = pnand %p400_p8, %p394_p5 }
  0x31   :  { %404 = shalt.err (!%p401_p9)
}
  0x32   :  { %48 = dma.hbm_to_vmem [thread:$0]  %s540_s3, 256, %s43_s10, [#allocation6], %s434_s28, %s434_s28, %s435_s29  }
  0x33   :  { %427 = dma.done.wait [#allocation3], 128  }
  0x34   :  { %428 = vsyncadd [#allocation3], 4294967168 }
  0x35   :  { %429 = dma.done.wait [#allocation6], 768  }
  0x36   :  { %430 = vsyncadd [#allocation6], 4294966528  ;;  %v438_v0 = vmov 0.0   ;;  %vm439_vm0 = vmmov 0   ;;  %v333_v1 = vld [vmem:[#allocation5] sm:$0xff]   ;;  %v334_v2 = vld [vmem:[#allocation5 + $0x8] sm:$0xff]  }
  0x37   :  { %301 = vmatprep.subr.bf16.mxu0 %v438_v0  ;;  %305 = vmatprep.mubr.msk.bf16.mxu0 %vm439_vm0, %v438_v0  ;;  %v61_v3 = vld [vmem:[#allocation2] sm:$0xff]  ;;  %vm84_vm1 = vcmask 261120   ;;  %v335_v5 = vld [vmem:[#allocation5 + $0x10] sm:$0xff]   ;;  %v337_v7 = vld [vmem:[#allocation7] sm:$0xff]   ;;  %s440_s9 = smov [#allocation8]  }
  0x38   :  { %309 = vmatprep.subr.bf16.mxu1 %v438_v0  ;;  %313 = vmatprep.mubr.msk.bf16.mxu1 %vm439_vm0, %v438_v0  ;;  %v62_v4 = vpack.c.bf16 %v61_v3, %v61_v3  ;;  %v336_v6 = vld [vmem:[#allocation5 + $0x18] sm:$0xff]   ;;  %v338_v16 = vld [vmem:[#allocation7 + $0x8] sm:$0xff]   ;;  %s270_s10 = sshll.u32 %s440_s9, 4  ;;  %s271_s10 = int_to_ptr.vmem [resolvable:$true] %s270_s10 }
  0x39   :  { %302 = vmatpush3.bf16.msra.mxu0 %v333_v1  ;;  %310 = vmatpush3.bf16.msra.mxu1 %v335_v5  ;;  %v280_v8 = vld [vmem:[%s539_s2] ss:$0 sm:$0xff]  ;;  %v284_v17 = vld [vmem:[%s539_s2 + $0x1] ss:$0 sm:$0xff]  ;;  %s405_s2 = scalar_lea.vmem %s271_s10, 128  ;;  %p410_p11 = scmp.lt.s32.totalorder %s271_s10, %s271_s10 }
  0x3a   :  { %303 = vmatprep.subr.bf16.mxu0 %v438_v0  ;;  %311 = vmatprep.subr.bf16.mxu1 %v438_v0  ;;  %v288_v25 = vld [vmem:[%s541_s4] ss:$0 sm:$0xff]  ;;  %p406_p10 = scmp.ne.s32.totalorder %s271_s10, %s405_s2  ;;  %p411_p12 = scmp.lt.s32.totalorder %s405_s2, %s405_s2 }
  0x3c   :  { %p412_p13 = por %p411_p12, %p410_p11 }
  0x3d   :  { %304 = vmatpush3.bf16.msra.mxu0 %v334_v2  ;;  %312 = vmatpush3.bf16.msra.mxu1 %v336_v6 }
  0x3e   :  { %317 = vmatprep.subr.bf16.mxu0 %v438_v0  ;;  %p413_p0 = pnand %p412_p13, %p406_p10 }
  0x40   :  { %306 = vmatmul.mubr.msk.bf16.vlgmr.msra.gmra.mrb[0].mxu0 %vm84_vm1, %v62_v4 }
  0x41   :  { %321 = vmatprep.mubr.msk.bf16.mxu0 %vm439_vm0, %v438_v0  ;;  %318 = vmatpush3.bf16.msra.mxu0 %v337_v7 }
  0x42   :  { %319 = vmatprep.subr.bf16.mxu0 %v438_v0 }
  0x45   :  { %320 = vmatpush3.bf16.msra.mxu0 %v338_v16 }
 0x113   :  { %v122_v9 = vpop.f32.mrb[0].mxu0 }
 0x114   :  { %v123_v10 = vadd.f32 %v280_v8, %v122_v9  ;;  %v307_v11 = vpop.f32.mrb[1].mxu0 }
 0x115   :  { %v125_v12 = vpop.f32.mrb[2].mxu0 }
 0x116   :  { %v128_v13 = vmax.f32 %v123_v10, 0.0  ;;  %v308_v14 = vpop.f32.mrb[3].mxu0 }
 0x118   :  { %v129_v15 = vpack.c.bf16 %v128_v13, %v128_v13 }
 0x11a   :  { %314 = vmatmul.mubr.msk.bf16.vlgmr.msra.gmra.mrb[0].mxu1 %vm84_vm1, %v129_v15 }
 0x1ed   :  { %v189_v18 = vpop.f32.mrb[0].mxu1 }
 0x1ee   :  { %v190_v19 = vadd.f32 %v284_v17, %v189_v18  ;;  %v315_v20 = vpop.f32.mrb[1].mxu1 }
 0x1ef   :  { %v192_v21 = vpop.f32.mrb[2].mxu1 }
 0x1f0   :  { %v195_v22 = vmax.f32 %v190_v19, 0.0  ;;  %v316_v23 = vpop.f32.mrb[3].mxu1 }
 0x1f2   :  { %v196_v24 = vpack.c.bf16 %v195_v22, %v195_v22 }
 0x1f4   :  { %322 = vmatmul.mubr.msk.bf16.vlgmr.msra.gmra.mrb[4].mxu0 %vm84_vm1, %v196_v24 }
 0x2c7   :  { %v257_v26 = vpop.f32.mrb[4].mxu0 }
 0x2c8   :  { %v258_v27 = vadd.f32 %v288_v25, %v257_v26  ;;  %v323_v28 = vpop.f32.mrb[5].mxu0 }
 0x2c9   :  { %v260_v29 = vpop.f32.mrb[6].mxu0 }
 0x2ca   :  { %263 = vst [vmem:[#allocation8] sm:$0xff] %v258_v27  ;;  %v324_v30 = vpop.f32.mrb[7].mxu0 }
 0x2cb   :  { %416 = shalt.err (!%p413_p0)
}
 0x2cc   :  { %s417_s4 = scalar_lea.hbm %s542_s5, 128 }
 0x2cd   :  { %p418_p1 = scmp.ne.s32.totalorder %s542_s5, %s417_s4  ;;  %p421_p2 = scmp.lt.u32.totalorder %s417_s4, %s542_s5 }
 0x2cf   :  { %p423_p3 = pnand %p421_p2, %p418_p1 }
 0x2d1   :  { %426 = shalt.err (!%p423_p3)
}
 0x2d2   :  { %273 = dma.vmem_to_hbm [thread:$0]  %s271_s10, 128, %s542_s5, [#allocation4]  }
 0x2d3   :  { %431 = dma.done.wait [#allocation4], 128  }
 0x2d4   :  { %432 = vsyncadd [#allocation4], 4294967168 }
 0x2d5   :  { %277 = vsyncpa [#allocation3], 1 }
 0x2d6   :  { %278 = vsyncpa [#allocation6], 1 }
 0x2d7   :  { %279 = vsyncpa [#allocation4], 1 }

</bundles_post_ra>
